<compile_context>
chip_gen: v7x
topology: tpu7x:2x2x1
jax: 0.10.0
libtpu: 0.0.40
codegen_flags: <defaults>
</compile_context>

<pallas_src>
import functools

import jax
import jax.numpy as jnp
from jax.experimental import pallas as pl
from jax.experimental.pallas import tpu as pltpu


def _cdiv(a: int, b: int) -> int:
    return -(-a // b)


def _round_up(x: int, m: int) -> int:
    return _cdiv(x, m) * m


# ----------------------------------------------------------------------------
# Kernels
# ----------------------------------------------------------------------------
def _bbox_fused_kernel(idx_ref, w_ref, out_ref, *, kb: int,
                       rows_per_group: int):
    """Fused 4-way lookup: one multi-hot (TN, kb) x fused weight matmul.

    idx_ref : (TN, 4) int32 — bin indices with per-channel offsets pre-added.
    w_ref   : (R*kb, R*out_dim) f32 fused weight, whole array resident in VMEM.
    out_ref : (TN//R, R*out_dim) lane-dense output tile.
    """
    idx = idx_ref[...]                                       # (TN, 4) int32
    tn = idx.shape[0]

    # Offsets were hoisted into the wrapper: just 4 compares + 3 ORs.
    iota = jax.lax.broadcasted_iota(jnp.int32, (tn, kb), 1)
    hot = idx[:, 0:1] == iota
    for c in range(1, 4):
        hot = jnp.logical_or(hot, idx[:, c:c + 1] == iota)
    onehot = hot.astype(jnp.float32)                         # (TN, kb)

    r = rows_per_group
    if r == 1:
        out_ref[...] = jnp.dot(
            onehot, w_ref[...],
            preferred_element_type=jnp.float32).astype(out_ref.dtype)
    else:
        # Pack R consecutive (pre-permuted) rows into one lane-dense output
        # row: R row-block matmuls against kron(I_R, W_base), combined with a
        # pairwise (tree) reduction to keep the dependency chain short.
        tp = tn // r
        parts = [jnp.dot(onehot[g * tp:(g + 1) * tp, :],
                         w_ref[g * kb:(g + 1) * kb, :],
                         preferred_element_type=jnp.float32)
                 for g in range(r)]
        while len(parts) > 1:
            nxt = [parts[i] + parts[i + 1] for i in range(0, len(parts) - 1, 2)]
            if len(parts) % 2:
                nxt.append(parts[-1])
            parts = nxt
        out_ref[...] = parts[0].astype(out_ref.dtype)


def _bbox_split_kernel(idx_ref, w_ref, out_ref, *, nb: int, d: int):
    """Per-channel lookups for emb_concat when 4*nb exceeds one MXU K tile.

    idx_ref : (TN, 4) int32 raw bin indices.
    w_ref   : (4*nb, d) row-stacked tables, whole array resident in VMEM.
    out_ref : (TN, 4*d) output tile.
    """
    idx = idx_ref[...]
    tn = idx.shape[0]
    iota = jax.lax.broadcasted_iota(jnp.int32, (tn, nb), 1)
    parts = []
    for c in range(4):
        hot_c = (idx[:, c:c + 1] == iota).astype(jnp.float32)   # (TN, nb)
        parts.append(jnp.dot(hot_c, w_ref[c * nb:(c + 1) * nb, :],
                             preferred_element_type=jnp.float32))
    if d % 128 == 0:
        # Static, lane-aligned, unmasked slice stores.
        for c in range(4):
            out_ref[:, c * d:(c + 1) * d] = parts[c].astype(out_ref.dtype)
    else:
        out_ref[...] = jnp.concatenate(parts, axis=-1).astype(out_ref.dtype)


# ----------------------------------------------------------------------------
# Tiling / VMEM budgeting
# ----------------------------------------------------------------------------
def _vmem_limit_bytes() -> int:
    """Generation-aware VMEM limit (v7x: 64 MiB physical, v5e/v6e: 128 MiB)."""
    try:
        cap = int(pltpu.get_tpu_info().vmem_capacity_bytes)
    except Exception:
        cap = 64 * 1024 * 1024            # conservative fallback
    return min(int(cap * 0.8), 100 * 1024 * 1024)


def _choose_row_tile(n_rows: int, out_dim: int, kb: int, r: int,
                     weight_bytes: int, vmem_limit: int):
    """Rows per grid step (multiple of 8*r), VMEM-budgeted, even grid count."""
    row_quant = 8 * r
    # f32 bytes per ORIGINAL row: idx tile (2 buffers) + one-hot + matmul
    # partials/result + output tile (2 buffers).
    per_row = 4 * (2 * 4 + kb + (3 + r) * out_dim)
    # Weight budgeted at 2x in case the runtime still double-buffers it.
    budget = max(vmem_limit - 2 * weight_bytes - (4 << 20), 2 << 20)
    tn = min(8192, max(row_quant, budget // per_row))
    tn = min(tn, _round_up(n_rows, row_quant))
    tn = max(row_quant, (tn // row_quant) * row_quant)

    steps = _cdiv(n_rows, tn)
    if n_rows >= 2 * row_quant:
        # >= 2 grid steps and an EVEN count so both v7x TensorCores get work.
        steps = max(2, steps)
        if steps % 2:
            steps += 1
        tn = max(row_quant, _round_up(_cdiv(n_rows, steps), row_quant))
        steps = max(2, _cdiv(n_rows, tn))
        if steps % 2:
            steps += 1
    return tn, steps


# ----------------------------------------------------------------------------
# Wrapper
# ----------------------------------------------------------------------------
def bbox_encoder(bbox: jax.Array,
                 x_w: jax.Array, y_w: jax.Array, w_w: jax.Array, h_w: jax.Array,
                 fusion: str = "emb_concat",
                 out_dtype=jnp.float32) -> jax.Array:
    """bbox: (B, S, 4) int; weights: (num_bins, D) float32 each."""
    if fusion not in ("emb_concat", "emb_add"):
        # TODO(synk): fusion='linear' raises NotImplementedError in the
        # original module as well — nothing to translate.
        raise NotImplementedError(fusion)

    B, S, four = bbox.shape
    assert four == 4
    num_bins, D = x_w.shape
    out_dim = 4 * D if fusion == "emb_concat" else D
    tables = [t.astype(jnp.float32) for t in (x_w, y_w, w_w, h_w)]

    # Pad the bin axis to a multiple of 8 so every weight slice the kernels
    # take is sublane-aligned (padded rows are never selected).
    nb = _round_up(num_bins, 8)
    if nb != num_bins:
        tables = [jnp.pad(t, ((0, nb - num_bins), (0, 0))) for t in tables]
    kb = 4 * nb

    # Lane packing: pack r original rows per stored row when out_dim < 128.
    if out_dim >= 128:
        r = 1
    elif 128 % out_dim == 0:
        r = 128 // out_dim
    else:
        r = _cdiv(128, out_dim)

    # Path selection: past one MXU K tile the block-diagonal emb_concat weight
    # is 75% zeros -> 4 dense per-channel dots instead.
    use_split = (fusion == "emb_concat") and (kb > 128) and (r == 1)

    w_stacked = jnp.concatenate(tables, axis=0)              # (4*nb, D)
    if use_split:
        w_fused = w_stacked
        onehot_cols = kb                                      # budget estimate
    elif fusion == "emb_add":
        w_base = w_stacked                                    # multi-hot sums rows
        w_fused = (w_base if r == 1 else
                   jnp.kron(jnp.eye(r, dtype=jnp.float32), w_base))
        onehot_cols = kb
    else:  # emb_concat fused block-diagonal (kb <= one K tile: zeros are free)
        w_base = jnp.zeros((kb, out_dim), jnp.float32)
        for c in range(4):
            w_base = w_base.at[c * nb:(c + 1) * nb,
                               c * D:(c + 1) * D].set(tables[c])
        w_fused = (w_base if r == 1 else
                   jnp.kron(jnp.eye(r, dtype=jnp.float32), w_base))
        onehot_cols = kb

    # --- indices: flatten, clamp, offset, pad, (maybe) permute for packing ---
    n_rows = B * S
    idx = jnp.clip(bbox.reshape(n_rows, 4).astype(jnp.int32), 0, num_bins - 1)
    if not use_split:
        # Hoist the per-channel column shift out of the kernel's one-hot loop.
        idx = idx + jnp.arange(4, dtype=jnp.int32)[None, :] * nb

    weight_bytes = int(w_fused.size) * 4
    vmem_limit = _vmem_limit_bytes()
    tn, steps = _choose_row_tile(n_rows, out_dim, onehot_cols, r,
                                 weight_bytes, vmem_limit)
    npad = steps * tn
    if npad != n_rows:
        idx = jnp.pad(idx, ((0, npad - n_rows), (0, 0)))

    tp = tn // r
    if r > 1:
        # Within each TN-row chunk, reorder rows (interleave -> block) so the
        # packed output is a free row-major view of the (N, out_dim) result.
        idx = idx.reshape(steps, tp, r, 4).transpose(0, 2, 1, 3).reshape(npad, 4)

    # Invariant fused weight: whole array resident in VMEM (not re-fetched per
    # grid step); its size was subtracted from the row-tile budget above.
    w_spec = pl.BlockSpec(memory_space=pltpu.MemorySpace.VMEM)

    if use_split:
        kernel = functools.partial(_bbox_split_kernel, nb=nb, d=D)
        out_rows, out_cols, row_tile = npad, out_dim, tn
    else:
        kernel = functools.partial(_bbox_fused_kernel, kb=kb, rows_per_group=r)
        out_rows, out_cols, row_tile = npad // r, r * out_dim, tp

    out_packed = pl.pallas_call(
        kernel,
        out_shape=jax.ShapeDtypeStruct((out_rows, out_cols), out_dtype),
        grid_spec=pltpu.PrefetchScalarGridSpec(
            num_scalar_prefetch=0,
            grid=(steps,),
            in_specs=[
                pl.BlockSpec((tn, 4), lambda i: (i, 0)),      # index rows
                w_spec,                                       # fused weight
            ],
            out_specs=pl.BlockSpec((row_tile, out_cols), lambda i: (i, 0)),
        ),
        compiler_params=pltpu.CompilerParams(
            dimension_semantics=("parallel",),
            vmem_limit_bytes=vmem_limit),
    )(idx, w_fused)

    out = out_packed.reshape(npad, out_dim)[:n_rows]
    return out.reshape(B, S, out_dim)


# ----------------------------------------------------------------------------
# Reference + self-test
# ----------------------------------------------------------------------------
def _reference(bbox, x_w, y_w, w_w, h_w, fusion):
    tables = (x_w, y_w, w_w, h_w)
    embs = [jnp.take(tables[c], bbox[..., c], axis=0) for c in range(4)]
    if fusion == "emb_add":
        return sum(embs)
    return jnp.concatenate(embs, axis=-1)


if __name__ == "__main__":
    key = jax.random.PRNGKey(0)
    B, S = 2, 8
    ok = True

    # Config A (32 bins, D=32): fused block-diag path + r>1 lane packing.
    # Config B (64 bins, D=128): per-channel split path for emb_concat.
    for num_bins, D in ((32, 32), (64, 128)):
        keys = jax.random.split(jax.random.fold_in(key, num_bins), 5)
        bbox = jax.random.randint(keys[0], (B, S, 4), 0, num_bins,
                                  dtype=jnp.int32)
        tabs = [jax.random.normal(k, (num_bins, D), jnp.float32)
                for k in keys[1:]]
        for fusion in ("emb_concat", "emb_add"):
            out = bbox_encoder(bbox, *tabs, fusion=fusion)
            out = jax.block_until_ready(out)
            ref = _reference(bbox, *tabs, fusion)
            ok &= bool(jnp.allclose(out, ref, atol=1e-5, rtol=1e-5))
            expected = (B, S, 4 * D) if fusion == "emb_concat" else (B, S, D)
            ok &= (out.shape == expected)

    if ok:
        print("KERNEL_OK")
    else:
        print("KERNEL_MISMATCH")
</pallas_src>

<mosaic_0001>
module attributes {stable_mosaic.version = 11 : i64} {
  func.func @_bbox_fused_kernel(%arg0: i32, %arg1: memref<8x4xi32, #tpu.memory_space<vmem>>, %arg2: memref<128x128xf32, #tpu.memory_space<vmem>>, %arg3: memref<8x128xf32, #tpu.memory_space<vmem>>) attributes {dimension_semantics = [#tpu.dimension_semantics<parallel>], iteration_bounds = array<i64: 2>, scalar_prefetch = 0 : i64, scratch_operands = 0 : i64, tpu.core_type = #tpu.core_type<tc>, window_params = [{transform_indices = @transform_0, window_bounds = array<i64: 8, 4>}, {pipeline_mode = #tpu.pipeline_mode<synchronous>, transform_indices = @transform_1, window_bounds = array<i64: 128, 128>}, {transform_indices = @transform_2, window_bounds = array<i64: 8, 128>}]} {
    %c0 = arith.constant 0 : index
    %c0_0 = arith.constant 0 : index
    %0 = vector.load %arg1[%c0, %c0_0] : memref<8x4xi32, #tpu.memory_space<vmem>>, vector<8x4xi32>
    %1 = tpu.iota {dimensions = array<i32: 1>} : vector<8x128xi32>
    %2 = vector.extract_strided_slice %0 {offsets = [0, 0], sizes = [8, 1], strides = [1, 1]} : vector<8x4xi32> to vector<8x1xi32>
    %3 = vector.broadcast %2 : vector<8x1xi32> to vector<8x128xi32>
    %4 = arith.cmpi eq, %3, %1 : vector<8x128xi32>
    %5 = vector.extract_strided_slice %0 {offsets = [0, 1], sizes = [8, 1], strides = [1, 1]} : vector<8x4xi32> to vector<8x1xi32>
    %6 = vector.broadcast %5 : vector<8x1xi32> to vector<8x128xi32>
    %7 = arith.cmpi eq, %6, %1 : vector<8x128xi32>
    %8 = arith.ori %4, %7 : vector<8x128xi1>
    %9 = vector.extract_strided_slice %0 {offsets = [0, 2], sizes = [8, 1], strides = [1, 1]} : vector<8x4xi32> to vector<8x1xi32>
    %10 = vector.broadcast %9 : vector<8x1xi32> to vector<8x128xi32>
    %11 = arith.cmpi eq, %10, %1 : vector<8x128xi32>
    %12 = arith.ori %8, %11 : vector<8x128xi1>
    %13 = vector.extract_strided_slice %0 {offsets = [0, 3], sizes = [8, 1], strides = [1, 1]} : vector<8x4xi32> to vector<8x1xi32>
    %14 = vector.broadcast %13 : vector<8x1xi32> to vector<8x128xi32>
    %15 = arith.cmpi eq, %14, %1 : vector<8x128xi32>
    %16 = arith.ori %12, %15 : vector<8x128xi1>
    %17 = arith.extui %16 : vector<8x128xi1> to vector<8x128xi32>
    %18 = arith.sitofp %17 : vector<8x128xi32> to vector<8x128xf32>
    %c0_1 = arith.constant 0 : index
    %c0_2 = arith.constant 0 : index
    %19 = vector.load %arg2[%c0_1, %c0_2] : memref<128x128xf32, #tpu.memory_space<vmem>>, vector<128x128xf32>
    %cst = arith.constant dense<0.000000e+00> : vector<8x128xf32>
    %20 = tpu.matmul %18, %19, %cst {dimension_numbers = #tpu.dot_dimension_numbers<[1], [0], [0], [1], [0, 0, 1, 1], [], []>} : vector<8x128xf32>, vector<128x128xf32>, vector<8x128xf32> -> vector<8x128xf32>
    %c0_3 = arith.constant 0 : index
    %c0_4 = arith.constant 0 : index
    %21 = vector.load %arg3[%c0_3, %c0_4] : memref<8x128xf32, #tpu.memory_space<vmem>>, vector<8x128xf32>
    tpu.vector_store %arg3[%c0_3, %c0_4], %20 {strides = array<i32>} : memref<8x128xf32, #tpu.memory_space<vmem>>, vector<8x128xf32>,
    return
  }
  func.func @transform_0(%arg0: i32) -> (i32, i32) {
    %c0_i32 = arith.constant 0 : i32
    %c0_i32_0 = arith.constant 0 : i32
    return %arg0, %c0_i32 : i32, i32
  }
  func.func @transform_1(%arg0: i32) -> (i32, i32) {
    %c0_i32 = arith.constant 0 : i32
    %c0_i32_0 = arith.constant 0 : i32
    %c0_i32_1 = arith.constant 0 : i32
    return %c0_i32, %c0_i32_0 : i32, i32
  }
  func.func @transform_2(%arg0: i32) -> (i32, i32) {
    %c0_i32 = arith.constant 0 : i32
    %c0_i32_0 = arith.constant 0 : i32
    return %arg0, %c0_i32 : i32, i32
  }
}

</mosaic_0001>

<bundles_post_ra>
// kernel: tpu_custom_call.1
= control target key start
LH: loop header
LB: loop body
LE: loop exit
PB: predicated region body
PF: predicated region fallthrough
CT: control target
= control target key end

     0   :  { %7 = vsyncpa [#allocation3], 0  ;;  %s763_s0 = inlined_call_operand.vmem [shape: s32[16,4], index: 0, kind: input, shape index: {}]   ;;  %s764_s1 = inlined_call_operand.hbm [shape: f32[128,128], index: 1, kind: input, shape index: {}]   ;;  %s765_s2 = inlined_call_operand.hbm [shape: f32[16,128], index: 2, kind: output, shape index: {}]  }
   0x1   :  { %8 = vsyncpa [#allocation4], 0 }
   0x2   :  { %10 = vsyncpa [#allocation4 + $0x1], 0  ;;  %s628_s9 = smov 0   ;;  %s630_s10 = smov 0  }
   0x3   :  { %s632_s11 = smov 0   ;;  %s634_s12 = smov 0  }
   0x4 LB: > { %s649_s13 = sadd.s32 4294967295, %s599_s12   ;;  %s350_s14 = sadd.s32 4294967294, %s599_s12   ;;  %s599_s12 = sphi %s634_s12, %s781_s12   ;;  %s595_s11 = sphi %s632_s11, %s780_s11   ;;  %s591_s10 = sphi %s630_s10, %s779_s10   ;;  %s587_s9 = sphi %s628_s9, %s778_s9  }
   0x5   : > { %s653_s15 = sadd.s32 1, %s599_s12   ;;  %s70_s16 = sadd.s32 1, %s595_s11 }
   0x6   : > { %s67_s17 = ssub.s32 %s599_s12, %s653_s15  ;;  %p80_p0 = scmp.ne.s32.totalorder %s595_s11, %s591_s10 }
   0x7   : > { %p68_p1 = scmp.eq.s32.totalorder %s67_s17, 0  ;;  %p81_p2 = scmp.eq.s32.totalorder %s649_s13, 1 }
   0x8   : > { %p86_p3 = scmp.ne.s32.totalorder %s591_s10, %s587_s9  ;;  %p87_p4 = scmp.eq.s32.totalorder %s350_s14, 1 }
   0x9   : > { %s664_s18 = scalar_select %p68_p1, %s595_s11, %s70_s16  }
   0xa   : > { %p666_p5 = por %p81_p2, %p80_p0  ;;  %p670_p6 = por %p87_p4, %p86_p3 }
   0xb   : > { %p351_p7 = scmp.ge.s32.totalorder %s599_s12, 1  ;;  %p94_p8 = scmp.lt.s32.totalorder %s599_s12, 3 }
   0xc   : > { %s769_s19 = scalar_select %p666_p5, 1, 0 }
   0xd   : > { %s770_s20 = scalar_select %p670_p6, 1, 0 }
   0xe   : > { %p766_p9 = scmp.eq.s32.totalorder %s649_s13, 0  ;;  %p677_p10 = pnand %p351_p7, %p94_p8 }
   0xf   : > { %s601_s22 = smov [#allocation2]   ;;  %s505_s27 = scalar_lea.hbm %s764_s1, 2048 }
  0x10   : > { %s771_s21 = scalar_select %p677_p10, 1, 0 }
  0x11   : > { %s106_s23 = sshll.u32 %s601_s22, 4  ;;  %p446_p11 = pneg %p677_p10  ;;  %s107_s23 = int_to_ptr.vmem [resolvable:$true] %s106_s23 }
  0x12   : > { %p506_p13 = scmp.ne.s32.totalorder %s764_s1, %s505_s27  ;;  %p512_p3 = scmp.lt.u32.totalorder %s505_s27, %s764_s1 }
  0x13   : > { %p685_p12 = pnand %p766_p9, %p446_p11 }
  0x15   : > { %p507_p0 = pneg %p685_p12 }
  0x17   : > { %p508_p1 = pnand %p507_p0, %p506_p13 }
  0x19   : > { %p509_p2 = pneg %p508_p1 }
  0x1b   : > { %p514_p4 = pnand %p512_p3, %p509_p2 }
  0x1d   : > { %517 = shalt.err (!%p514_p4)
}
  0x1e   : > { %s518_s4 = scalar_lea.vmem %s107_s23, 2048  ;;  %p526_p9 = scmp.lt.s32.totalorder %s107_s23, %s107_s23 }
  0x1f   : > { %p519_p7 = scmp.ne.s32.totalorder %s107_s23, %s518_s4  ;;  %p527_p6 = scmp.lt.s32.totalorder %s518_s4, %s518_s4 }
  0x21   : > { %p521_p8 = pnand %p519_p7, %p507_p0  ;;  %p528_p5 = por %p527_p6, %p526_p9 }
  0x23   : > { %p522_p11 = pneg %p521_p8 }
  0x25   : > { %p529_p10 = pnand %p528_p5, %p522_p11 }
  0x27   : > { %532 = shalt.err (!%p529_p10)
}
  0x28   : > { %s602_s5 = smov 128   ;;  %s603_s6 = smov 8  }
  0x29   : > { %449 = dma.hbm_to_vmem [thread:$0]  (!%p685_p12), %s764_s1, 2048, %s107_s23, [#allocation3], %s602_s5, %s602_s5, %s603_s6  }
  0x2a   : > { %p773_p13 = scmp.ne.s32.totalorder %s771_s21, 0 }
  0x2b   : > { %p774_p1 = scmp.eq.s32.totalorder (!%p773_p13), %s649_s13, 0 }
  0x2c   : > { %129 = sbr.rel (%p773_p13) target bundleno = 422 (0x1a6), region = 28 }
  0x33   : > { %578 = dma.done.wait (%p774_p1), [#allocation3], 2048   ;;  %p775_p0 = pmov %p774_p1 }
  0x34   : > { %p150_p5 = scmp.lt.s32.totalorder %s649_s13, 1  ;;  %v604_v0 = vmov 0   ;;  %v605_v1 = vmov 2   ;;  %v606_v2 = vmov 0.0|0.0   ;;  %v178_v4 = vld [vmem:[#allocation2] sm:$0xff]  ;;  %v179_v5 = vld [vmem:[#allocation2 + $0x8] sm:$0xff]  ;;  %v155_v31 = vlaneseq }
  0x35   : > { %580 = vsyncadd (%p775_p0), [#allocation3], 4294965248  ;;  %500 = vset.pattern.permute.xlu0 %v604_v0  ;;  %502 = vset.pattern.permute.xlu1 %v605_v1  ;;  %v417_v6 = vpack.c.bf16 %v179_v5, %v178_v4  ;;  %v180_v7 = vld [vmem:[#allocation2 + $0x10] sm:$0xff]  ;;  %v181_v8 = vld [vmem:[#allocation2 + $0x18] sm:$0xff]  ;;  %v607_v12 = vmov 1   ;;  %v608_v13 = vmov 3  }
  0x36   : > { %s151_s14 = scalar_select %p150_p5, %s649_s13, 1  ;;  %416 = vmatprep.subr.bf16.mxu0 %v606_v2  ;;  %v420_v9 = vpack.c.bf16 %v181_v8, %v180_v7  ;;  %v182_v10 = vld [vmem:[#allocation2 + $0x20] sm:$0xff]  ;;  %v183_v11 = vld [vmem:[#allocation2 + $0x28] sm:$0xff]  ;;  %v184_v15 = vld [vmem:[#allocation2 + $0x30] sm:$0xff]  ;;  %vm609_vm0 = vmmov 0   ;;  %v610_v17 = vmov 0.0  }
  0x37   : > { %418 = vmatpush3.bf16.msra.mxu0 %v417_v6  ;;  %v423_v14 = vpack.c.bf16 %v183_v11, %v182_v10  ;;  %v185_v16 = vld [vmem:[#allocation2 + $0x38] sm:$0xff]  ;;  %413 = vmatprep.mubr.msk.f32.mxu0 %vm609_vm0, %v610_v17  ;;  %v186_v19 = vld [vmem:[#allocation2 + $0x40] sm:$0xff]  ;;  %v187_v20 = vld [vmem:[#allocation2 + $0x48] sm:$0xff]  ;;  %v156_v34 = vand.u32 127, %v155_v31  ;;  %v611_v37 = vmov 1.0   ;;  %s147_s23 = sand.u32 1, %s591_s10  }
  0x38   : > { %s357_s16 = sshll.u32 %s151_s14, 3  ;;  %419 = vmatprep.subr.bf16.mxu0 %v606_v2  ;;  %v426_v18 = vpack.c.bf16 %v185_v16, %v184_v15  ;;  %v429_v21 = vpack.c.bf16 %v187_v20, %v186_v19  ;;  %v188_v22 = vld [vmem:[#allocation2 + $0x50] sm:$0xff]  ;;  %v189_v23 = vld [vmem:[#allocation2 + $0x58] sm:$0xff]  ;;  %v190_v25 = vld [vmem:[#allocation2 + $0x60] sm:$0xff]  ;;  %s356_s24 = sshll.u32 %s147_s23, 3 }
  0x39   : > { %s153_s22 = scalar_lea.vmem %s763_s0, %s357_s16  ;;  %v432_v24 = vpack.c.bf16 %v189_v23, %v188_v22  ;;  %v191_v26 = vld [vmem:[#allocation2 + $0x68] sm:$0xff]  ;;  %v192_v28 = vld [vmem:[#allocation2 + $0x70] sm:$0xff]  ;;  %v193_v29 = vld [vmem:[#allocation2 + $0x78] sm:$0xff]  ;;  %s149_s25 = scalar_lea.vmem [#allocation5], %s356_s24 }
  0x3a   : > { %v154_v3 = vld [vmem:[%s153_s22] sm:$0xff]  ;;  %v435_v27 = vpack.c.bf16 %v191_v26, %v190_v25  ;;  %v438_v30 = vpack.c.bf16 %v193_v29, %v192_v28  ;;  %s279_s26 = sshll.u32 %s149_s25, 4  ;;  %s361_s27 = sshll.u32 %s649_s13, 7  ;;  %s718_s26 = int_to_ptr.vmem [resolvable:$true] %s279_s26 }
  0x3b   : > { %158 = vperm.xlu0 %500, %v154_v3   ;;  %167 = vperm.xlu1 %502, %v154_v3   ;;  %s723_s30 = scalar_lea.hbm %s765_s2, %s361_s27  ;;  %s266_s3 = scalar_lea.sflag [#allocation4], %s147_s23 }
  0x3c   : > { %421 = vmatpush3.bf16.msra.mxu0 %v420_v9  ;;  %s533_s4 = scalar_lea.vmem %s718_s26, 128  ;;  %p776_p9 = scmp.ne.s32.totalorder %s769_s19, 0 }
  0x3d   : > { %422 = vmatprep.subr.bf16.mxu0 %v606_v2  ;;  %p534_p6 = scmp.ne.s32.totalorder %s718_s26, %s533_s4  ;;  %s612_s13 = smov [#allocation5]  }
  0x3e   : > { %s537_s5 = sshll.u32 %s612_s13, 4  ;;  %s538_s5 = int_to_ptr.vmem [resolvable:$false] %s537_s5 }
  0x3f   : > { %501 = vset.pattern.permute.xlu0 %v607_v12  ;;  %503 = vset.pattern.permute.xlu1 %v608_v13  ;;  %p535_p10 = pnand %p534_p6, %p776_p9  ;;  %s539_s6 = scalar_lea.vmem %s538_s5, 256 }
  0x40   : > { %162 = vperm.xlu0 %501, %v154_v3   ;;  %172 = vperm.xlu1 %503, %v154_v3   ;;  %p540_p2 = scmp.lt.s32.totalorder %s718_s26, %s538_s5  ;;  %p541_p3 = scmp.lt.s32.totalorder %s539_s6, %s533_s4 }
  0x41   : > { %424 = vmatpush3.bf16.msra.mxu0 %v423_v14  ;;  %p536_p12 = pneg %p535_p10 }
  0x42   : > { %425 = vmatprep.subr.bf16.mxu0 %v606_v2  ;;  %p542_p4 = por %p541_p3, %p540_p2 }
  0x44   : > { %504 = vset.pattern.permute.xlu0 %v608_v13  ;;  %p543_p7 = pnand %p542_p4, %p536_p12 }
  0x45   : > { %427 = vmatpush3.bf16.msra.mxu0 %v426_v18 }
  0x46   : > { %428 = vmatprep.subr.bf16.mxu0 %v606_v2 }
  0x49   : > { %430 = vmatpush3.bf16.msra.mxu0 %v429_v21 }
  0x4a   : > { %431 = vmatprep.subr.bf16.mxu0 %v606_v2 }
  0x4d   : > { %433 = vmatpush3.bf16.msra.mxu0 %v432_v24 }
  0x4e   : > { %434 = vmatprep.subr.bf16.mxu0 %v606_v2 }
  0x51   : > { %436 = vmatpush3.bf16.msra.mxu0 %v435_v27 }
  0x52   : > { %437 = vmatprep.subr.bf16.mxu0 %v606_v2 }
  0x55   : > { %439 = vmatpush3.bf16.msra.mxu0 %v438_v30 }
  0xba   : > { %v159_v32 = vpop.permute.xlu0 %158  ;;  %v168_v33 = vpop.permute.xlu1 %167 }
  0xbb   : > { %vm160_vm1 = vcmp.eq.s32.totalorder %v159_v32, %v156_v34  ;;  %vm169_vm4 = vcmp.eq.s32.totalorder %v168_v33, %v156_v34 }
  0xbf   : > { %v163_v35 = vpop.permute.xlu0 %162  ;;  %v173_v36 = vpop.permute.xlu1 %172 }
  0xc0   : > { %vm164_vm2 = vcmp.eq.s32.totalorder %v163_v35, %v156_v34  ;;  %vm174_vm3 = vcmp.eq.s32.totalorder %v173_v36, %v156_v34 }
  0xc1   : > { %vm165_vm5 = vmor %vm160_vm1, %vm164_vm2 }
  0xc2   : > { %vm170_vm6 = vmor %vm165_vm5, %vm169_vm4 }
  0xc3   : > { %vm175_vm7 = vmor %vm170_vm6, %vm174_vm3 }
  0xc4   : > { %414 = vmatmul.mubr.msk.f32.vlgmr.msra.gmra.mrb[0].mxu0 %vm175_vm7, %v611_v37 }
 0x197   : > { %v260_v38 = vpop.f32.mrb[0].mxu0 }
 0x198   : > { %264 = vst [vmem:[%s149_s25] sm:$0xff] %v260_v38  ;;  %v415_v39 = vpop.f32.mrb[1].mxu0 }
 0x199   : > { %546 = shalt.err (!%p543_p7)
}
 0x19a   : > { %s547_s7 = scalar_lea.hbm %s723_s30, 128  ;;  %s551_s16 = scalar_lea.hbm %s765_s2, 256 }
 0x19b   : > { %p548_p8 = scmp.ne.s32.totalorder %s723_s30, %s547_s7  ;;  %p552_p1 = scmp.lt.u32.totalorder %s723_s30, %s765_s2 }
 0x19c   : > { %p553_p0 = scmp.lt.u32.totalorder %s551_s16, %s547_s7  ;;  %p555_p6 = scmp.lt.u32.totalorder %s547_s7, %s723_s30 }
 0x19d   : > { %p549_p11 = pnand %p548_p8, %p776_p9 }
 0x19e   : > { %p554_p5 = por %p553_p0, %p552_p1 }
 0x19f   : > { %p550_p13 = pneg %p549_p11 }
 0x1a0   : > { %p556_p10 = por %p555_p6, %p554_p5 }
 0x1a2   : > { %p557_p12 = pnand %p556_p10, %p550_p13 }
 0x1a4   : > { %560 = shalt.err (!%p557_p12)
}
 0x1a5   : > { %444 = dma.vmem_to_hbm [thread:$0]  (%p776_p9), %s718_s26, 128, %s723_s30, %s266_s3  }
 0x1a6 PF: > { %p456_p2 = scmp.ge.s32.totalorder %s599_s12, 2  ;;  %s291_s22 = sand.u32 1, %s587_s9  }
 0x1a7   : > { %p777_p3 = scmp.ne.s32.totalorder %s770_s20, 0  ;;  %s292_s23 = scalar_lea.sflag [#allocation4], %s291_s22 }
 0x1a9   : > { %p451_p4 = pnand %p456_p2, %p777_p3 }
 0x1ab   : > { %582 = dma.done.wait (!%p451_p4), %s292_s23, 128  }
 0x1ac   : > { %584 = vsyncadd (!%p451_p4), %s292_s23, 4294967168  ;;  %p13_p7 = scmp.ge.s32.totalorder %s653_s15, 4   ;;  %s778_s9 = smov %s591_s10 }
 0x1ad   : > { %s779_s10 = smov %s595_s11  ;;  %s780_s11 = smov %s664_s18 }
 0x1ae   : > { %s781_s12 = smov %s653_s15  ;;  %15 = sbr.rel (!%p13_p7) target bundleno = 4 (0x4), region = 68 }
 0x1b5   :  { %297 = vsyncpa [#allocation3], 1 }
 0x1b6   :  { %299 = vsyncpa [#allocation3 + $0x1], 1 }
 0x1b7   :  { %300 = vsyncpa [#allocation4], 1 }
 0x1b8   :  { %302 = vsyncpa [#allocation4 + $0x1], 1 }

</bundles_post_ra>
